<compile_context>
chip_gen: v6e
topology: v6e:2x2x1
jax: 0.10.0
libtpu: 0.0.40
codegen_flags: <defaults>
</compile_context>

<pallas_src>
import jax
import jax.numpy as jnp
from jax.experimental import pallas as pl
from jax.experimental.pallas import tpu as pltpu

# ------------------------- model hyper-parameters -------------------------
C_IMG = 3            # input image channels
C_FEAT = 8           # frontend / BEV feature channels
Z_BINS = 8           # depth bins produced by the dense transformer
NUM_CLASSES = 4      # occupancy classes
FOCAL_NORM = 16.0
IMG_H, IMG_W = 16, 16
KS = 3               # conv kernel size
FE_STRIDE = 2        # frontend stride
HF = IMG_H // FE_STRIDE          # frontend output height (8)
WF = IMG_W // FE_STRIDE          # frontend output width  (8)

FE_K = HF * C_IMG                # 24  (per-tap packed contraction dim)
FE_KCAT = KS * KS * FE_K         # 216 (9 taps concatenated along K)
FE_K_PAD = 256                   # K padded to a lane-aligned size (zeros)
FE_N = HF * C_FEAT               # 64  (frontend lanes: h-major, channel-minor)
TR_N = Z_BINS * C_FEAT           # 64  (BEV lanes: z-major, channel-minor)
CL_N = Z_BINS * NUM_CLASSES      # 32  (real logit lanes: z-major, class-minor)
OUT_LANES = 128                  # classifier N padded to 128 -> unmasked stores

B_TILE = 16                      # images per grid step
ROWS = B_TILE * WF               # 128 matmul rows per grid step (fills MXU M)
# NOTE: for very large batches on v6e (single TC, 128 MiB VMEM) B_TILE can be
# raised further; 16 keeps grid >= 2 for batches >= 32 so v7x's two
# TensorCores both get work.


# ----------------------------- Pallas kernel ------------------------------
def _pon_fused_kernel(lhs_ref,                      # (ROWS, FE_K_PAD) bf16 im2col
                      focal_ref,                    # (ROWS, 1)        f32 per-row scale
                      fe_w_ref, fe_b_ref,           # (FE_K_PAD, FE_N) bf16, (1, FE_N) f32
                      tr_w_ref, tr_b_ref,           # (FE_N, TR_N) bf16,    (1, TR_N) f32
                      sl_ref, sr_ref,               # (ROWS, ROWS) bf16 w-shift matrices
                      td_w_ref, td_b_ref,           # (3, TR_N, TR_N) bf16, (1, TR_N) f32
                      cl_w_ref, cl_b_ref,           # (TR_N, OUT_LANES) bf16, (1, OUT_LANES) f32
                      out_ref):                     # (ROWS, OUT_LANES) f32
    f32 = jnp.float32
    bf16 = jnp.bfloat16

    # ---- frontend: 3x3 / stride 2 / pad 1 conv + ReLU, ONE K=256 dot ------
    # feats[b*WF + w, h*C_FEAT + c] == frontend_feature[b, h, w, c]
    feats = jnp.dot(lhs_ref[...], fe_w_ref[...], preferred_element_type=f32)
    feats = jnp.maximum(feats + fe_b_ref[...], 0.0)            # (ROWS, FE_N)

    # ---- transformer: dense image-column -> BEV-column + focal scale ------
    bev = jnp.dot(feats.astype(bf16), tr_w_ref[...], preferred_element_type=f32)
    # bev[b*WF + w, z*C_FEAT + c] == bev[b, z, w, c]
    bev = jnp.maximum(bev + tr_b_ref[...], 0.0) * focal_ref[...]
    bev_bf = bev.astype(bf16)                                   # cast once

    # ---- topdown: 3x3 / stride 1 / pad 1 conv + ReLU on the BEV plane -----
    # z-shift (kh) is folded into the 3 block-tridiagonal weights; w-shift
    # (kw) is a per-image 0/1 shift matrix applied on the MXU (exact in bf16,
    # zero boundary built in, never crosses image blocks, no sublane relayout).
    bev_l = jnp.dot(sl_ref[...], bev_bf, preferred_element_type=f32).astype(bf16)
    bev_r = jnp.dot(sr_ref[...], bev_bf, preferred_element_type=f32).astype(bf16)
    acc = jnp.dot(bev_l, td_w_ref[0], preferred_element_type=f32)
    acc += jnp.dot(bev_bf, td_w_ref[1], preferred_element_type=f32)
    acc += jnp.dot(bev_r, td_w_ref[2], preferred_element_type=f32)
    td = jnp.maximum(acc + td_b_ref[...], 0.0)                  # (ROWS, TR_N)

    # ---- classifier: 1x1 conv -> logits (N zero-padded to 128 lanes) ------
    logits = jnp.dot(td.astype(bf16), cl_w_ref[...], preferred_element_type=f32)
    # out[b*WF + w, z*NUM_CLASSES + k] == logits[b, z, w, k]   (lanes >= CL_N are 0)
    out_ref[...] = logits + cl_b_ref[...]


# ------------------------------- JAX glue ----------------------------------
def _make_im2col(x_nhwc):
    """Wrapper-side im2col for the stride-2 frontend conv.

    lhs[b*WF + w, (kh*3 + kw)*FE_K + h*C_IMG + c] = x_pad[b, 2h + kh, 2w + kw, c]
    K is zero-padded from 216 to 256 so the padded MACs are numerically inert.
    """
    B = x_nhwc.shape[0]
    xp = jnp.pad(x_nhwc, ((0, 0), (1, 1), (1, 1), (0, 0)))      # (B, H+2, W+2, C)
    taps = []
    for kh in range(KS):
        for kw in range(KS):
            sub = xp[:, kh:kh + 2 * HF:2, kw:kw + 2 * WF:2, :]  # (B, HF, WF, C)
            sub = jnp.transpose(sub, (0, 2, 1, 3)).reshape(B, WF, FE_K)
            taps.append(sub)
    lhs = jnp.concatenate(taps, axis=-1)                        # (B, WF, 216)
    lhs = jnp.pad(lhs, ((0, 0), (0, 0), (0, FE_K_PAD - FE_KCAT)))
    return lhs.reshape(B * WF, FE_K_PAD)


def init_params(key):
    """Deterministic synthetic weights for the four stages (logical layout)."""
    ks = jax.random.split(key, 8)

    def _w(k, shape):
        return jax.random.normal(k, shape, jnp.float32) * jnp.sqrt(2.0 / shape[0])

    def _b(k, n):
        return 0.1 * jax.random.normal(k, (n,), jnp.float32)

    return {
        # frontend: 3x3 conv, stride 2, pad 1, C_IMG -> C_FEAT, ReLU
        # TODO(synk): real PON frontend is a ResNet-50 FPN; one conv scale here.
        "fe_w": _w(ks[0], (KS * KS * C_IMG, C_FEAT)),
        "fe_b": _b(ks[1], C_FEAT),
        # transformer: image column (HF*C) -> BEV column (Z*C), ReLU
        # TODO(synk): real DenseTransformer does calib-driven grid_sample
        #             resampling; calib supplies only a focal scale here.
        "tr_w": _w(ks[2], (HF * C_FEAT, Z_BINS * C_FEAT)),
        "tr_b": _b(ks[3], Z_BINS * C_FEAT),
        # topdown: 3x3 conv, stride 1, pad 1, C_FEAT -> C_FEAT, ReLU
        "td_w": _w(ks[4], (KS * KS * C_FEAT, C_FEAT)),
        "td_b": _b(ks[5], C_FEAT),
        # classifier: 1x1 conv, C_FEAT -> NUM_CLASSES, no activation
        "cl_w": _w(ks[6], (C_FEAT, NUM_CLASSES)),
        "cl_b": _b(ks[7], NUM_CLASSES),
    }


def pack_params(p, mm_dtype=jnp.bfloat16):
    """Pack logical conv weights into the kernel's fused block matrices."""
    eye_h = jnp.eye(HF, dtype=jnp.float32)
    eye_z = jnp.eye(Z_BINS, dtype=jnp.float32)

    # frontend: concatenate the 9 taps along K; each tap is block-diag over h.
    fe_blocks = [jnp.kron(eye_h, p["fe_w"][t * C_IMG:(t + 1) * C_IMG, :])
                 for t in range(KS * KS)]
    fe_wcat = jnp.concatenate(fe_blocks, axis=0)                # (216, FE_N)
    fe_wcat = jnp.pad(fe_wcat, ((0, FE_K_PAD - FE_KCAT), (0, 0)))  # zero K pad

    # topdown: sum the kh (z-shift) taps into 3 per-kw block-tridiagonal mats.
    td_kw = []
    for kw in range(KS):
        w = jnp.zeros((TR_N, TR_N), jnp.float32)
        for kh in range(KS):
            t = kh * KS + kw
            zs = jnp.eye(Z_BINS, Z_BINS, k=1 - kh, dtype=jnp.float32)
            w = w + jnp.kron(zs, p["td_w"][t * C_FEAT:(t + 1) * C_FEAT, :])
        td_kw.append(w)
    td_wkw = jnp.stack(td_kw)                                   # (3, TR_N, TR_N)

    # classifier: block-diag over z, N zero-padded to 128 lanes.
    cl_wcat = jnp.kron(eye_z, p["cl_w"])                        # (TR_N, CL_N)
    cl_wcat = jnp.pad(cl_wcat, ((0, 0), (0, OUT_LANES - CL_N)))
    cl_bcat = jnp.pad(jnp.tile(p["cl_b"], Z_BINS), (0, OUT_LANES - CL_N))

    # per-image w-shift matrices (block-diag over the B_TILE images in a tile).
    shift_l = jnp.eye(WF, WF, k=-1, dtype=jnp.float32)          # row w <- row w-1
    shift_r = jnp.eye(WF, WF, k=1, dtype=jnp.float32)           # row w <- row w+1
    eye_b = jnp.eye(B_TILE, dtype=jnp.float32)

    return {
        "fe_w": fe_wcat.astype(mm_dtype),
        "fe_b": jnp.tile(p["fe_b"], HF).reshape(1, FE_N).astype(jnp.float32),
        "tr_w": p["tr_w"].astype(mm_dtype),
        "tr_b": p["tr_b"].reshape(1, TR_N).astype(jnp.float32),
        "sl": jnp.kron(eye_b, shift_l).astype(mm_dtype),        # (ROWS, ROWS)
        "sr": jnp.kron(eye_b, shift_r).astype(mm_dtype),        # (ROWS, ROWS)
        "td_w": td_wkw.astype(mm_dtype),
        "td_b": jnp.tile(p["td_b"], Z_BINS).reshape(1, TR_N).astype(jnp.float32),
        "cl_w": cl_wcat.astype(mm_dtype),
        "cl_b": cl_bcat.reshape(1, OUT_LANES).astype(jnp.float32),
    }


def pyramid_occupancy_network(image_nchw, calib, packed):
    """Fused forward. image_nchw: (B, 3, H, W), calib: (B, 3, 3) -> NCHW logits."""
    B = image_nchw.shape[0]
    n_tiles = pl.cdiv(B, B_TILE)
    B_pad = n_tiles * B_TILE

    x = jnp.transpose(image_nchw, (0, 2, 3, 1))                 # -> NHWC
    lhs = _make_im2col(x).astype(jnp.bfloat16)                  # (B*WF, FE_K_PAD)
    focal = calib[:, 0, 0] / jnp.float32(FOCAL_NORM)
    focal_rows = jnp.repeat(focal, WF).reshape(B * WF, 1).astype(jnp.float32)

    if B_pad != B:                                              # pad batch to tile
        pad_rows = (B_pad - B) * WF
        lhs = jnp.pad(lhs, ((0, pad_rows), (0, 0)))
        focal_rows = jnp.pad(focal_rows, ((0, pad_rows), (0, 0)))

    out = pl.pallas_call(
        _pon_fused_kernel,
        out_shape=jax.ShapeDtypeStruct((B_pad * WF, OUT_LANES), jnp.float32),
        grid=(n_tiles,),
        in_specs=[
            pl.BlockSpec((ROWS, FE_K_PAD), lambda t: (t, 0)),        # im2col LHS
            pl.BlockSpec((ROWS, 1), lambda t: (t, 0)),               # focal rows
            pl.BlockSpec((FE_K_PAD, FE_N), lambda t: (0, 0)),        # fe_w
            pl.BlockSpec((1, FE_N), lambda t: (0, 0)),               # fe_b
            pl.BlockSpec((FE_N, TR_N), lambda t: (0, 0)),            # tr_w
            pl.BlockSpec((1, TR_N), lambda t: (0, 0)),               # tr_b
            pl.BlockSpec((ROWS, ROWS), lambda t: (0, 0)),            # sl
            pl.BlockSpec((ROWS, ROWS), lambda t: (0, 0)),            # sr
            pl.BlockSpec((KS, TR_N, TR_N), lambda t: (0, 0, 0)),     # td_w
            pl.BlockSpec((1, TR_N), lambda t: (0, 0)),               # td_b
            pl.BlockSpec((TR_N, OUT_LANES), lambda t: (0, 0)),       # cl_w
            pl.BlockSpec((1, OUT_LANES), lambda t: (0, 0)),          # cl_b
        ],
        out_specs=pl.BlockSpec((ROWS, OUT_LANES), lambda t: (t, 0)),
        compiler_params=pltpu.CompilerParams(
            dimension_semantics=("parallel",)),
    )(lhs, focal_rows, packed["fe_w"], packed["fe_b"], packed["tr_w"],
      packed["tr_b"], packed["sl"], packed["sr"], packed["td_w"],
      packed["td_b"], packed["cl_w"], packed["cl_b"])

    # out[b*WF + w, z*NC + k] (first CL_N lanes) -> NCHW (B, NC, Z, W)
    out = out[:, :CL_N].reshape(B_pad, WF, Z_BINS, NUM_CLASSES)[:B]
    return jnp.transpose(out, (0, 3, 2, 1))


# --------------------- pure-JAX reference (f32, original layout) -----------
def _im2col(x, ksize, stride, pad):
    B, H, W, C = x.shape
    xp = jnp.pad(x, ((0, 0), (pad, pad), (pad, pad), (0, 0)))
    Ho = (H + 2 * pad - ksize) // stride + 1
    Wo = (W + 2 * pad - ksize) // stride + 1
    patches = []
    for i in range(ksize):
        for j in range(ksize):
            patches.append(xp[:, i:i + stride * Ho:stride, j:j + stride * Wo:stride, :])
    cols = jnp.concatenate(patches, axis=-1)
    return cols.reshape(B * Ho * Wo, ksize * ksize * C), (Ho, Wo)


def _reference_forward(image_nchw, calib, p):
    B = image_nchw.shape[0]
    x = jnp.transpose(image_nchw, (0, 2, 3, 1))
    cols, (Hf, Wf) = _im2col(x, KS, FE_STRIDE, 1)
    feats = jnp.maximum(cols @ p["fe_w"] + p["fe_b"], 0.0).reshape(B, Hf, Wf, C_FEAT)
    col_feats = jnp.transpose(feats, (0, 2, 1, 3)).reshape(B * Wf, Hf * C_FEAT)
    focal = calib[:, 0, 0] / jnp.float32(FOCAL_NORM)
    bev = jnp.maximum(col_feats @ p["tr_w"] + p["tr_b"], 0.0)
    bev = bev * jnp.repeat(focal, Wf)[:, None]
    bev = bev.reshape(B, Wf, Z_BINS, C_FEAT).transpose(0, 2, 1, 3)
    cols_td, (Zo, Wo) = _im2col(bev, KS, 1, 1)
    td = jnp.maximum(cols_td @ p["td_w"] + p["td_b"], 0.0)
    logits = (td @ p["cl_w"] + p["cl_b"]).reshape(B, Zo, Wo, NUM_CLASSES)
    return jnp.transpose(logits, (0, 3, 1, 2))


if __name__ == "__main__":
    key = jax.random.PRNGKey(0)
    k_img, k_par = jax.random.split(key)

    B = 2
    image = jax.random.normal(k_img, (B, C_IMG, IMG_H, IMG_W), jnp.float32)  # NCHW
    calib = jnp.stack([
        jnp.array([[16.0, 0.0, 8.0], [0.0, 16.0, 8.0], [0.0, 0.0, 1.0]], jnp.float32),
        jnp.array([[20.0, 0.0, 8.0], [0.0, 20.0, 8.0], [0.0, 0.0, 1.0]], jnp.float32),
    ])

    logical = init_params(k_par)
    packed = pack_params(logical)

    fwd = jax.jit(pyramid_occupancy_network)
    logits = fwd(image, calib, packed)
    jax.block_until_ready(logits)
    assert logits.shape == (B, NUM_CLASSES, Z_BINS, WF), logits.shape

    ref = _reference_forward(image, calib, logical)
    err = float(jnp.max(jnp.abs(logits - ref)))
    scale = float(jnp.max(jnp.abs(ref))) + 1e-6
    # bf16-MXU operands vs f32 reference across 4 chained matmul stages.
    assert err <= 0.08 * scale + 1e-2, (err, scale)

    print("KERNEL_OK")
</pallas_src>

<mosaic_0001>
module attributes {stable_mosaic.version = 11 : i64} {
  func.func @_pon_fused_kernel(%arg0: i32, %arg1: memref<128x256xbf16, #tpu.memory_space<vmem>>, %arg2: memref<128x1xf32, #tpu.memory_space<vmem>>, %arg3: memref<256x64xbf16, #tpu.memory_space<vmem>>, %arg4: memref<1x64xf32, #tpu.memory_space<vmem>>, %arg5: memref<64x64xbf16, #tpu.memory_space<vmem>>, %arg6: memref<1x64xf32, #tpu.memory_space<vmem>>, %arg7: memref<128x128xbf16, #tpu.memory_space<vmem>>, %arg8: memref<128x128xbf16, #tpu.memory_space<vmem>>, %arg9: memref<3x64x64xbf16, #tpu.memory_space<vmem>>, %arg10: memref<1x64xf32, #tpu.memory_space<vmem>>, %arg11: memref<64x128xbf16, #tpu.memory_space<vmem>>, %arg12: memref<1x128xf32, #tpu.memory_space<vmem>>, %arg13: memref<128x128xf32, #tpu.memory_space<vmem>>) attributes {dimension_semantics = [#tpu.dimension_semantics<parallel>], iteration_bounds = array<i64: 1>, scalar_prefetch = 0 : i64, scratch_operands = 0 : i64, tpu.core_type = #tpu.core_type<tc>, window_params = [{transform_indices = @transform_0, window_bounds = array<i64: 128, 256>}, {transform_indices = @transform_1, window_bounds = array<i64: 128, 1>}, {pipeline_mode = #tpu.pipeline_mode<synchronous>, transform_indices = @transform_2, window_bounds = array<i64: 256, 64>}, {pipeline_mode = #tpu.pipeline_mode<synchronous>, transform_indices = @transform_3, window_bounds = array<i64: 1, 64>}, {pipeline_mode = #tpu.pipeline_mode<synchronous>, transform_indices = @transform_4, window_bounds = array<i64: 64, 64>}, {pipeline_mode = #tpu.pipeline_mode<synchronous>, transform_indices = @transform_5, window_bounds = array<i64: 1, 64>}, {pipeline_mode = #tpu.pipeline_mode<synchronous>, transform_indices = @transform_6, window_bounds = array<i64: 128, 128>}, {pipeline_mode = #tpu.pipeline_mode<synchronous>, transform_indices = @transform_7, window_bounds = array<i64: 128, 128>}, {pipeline_mode = #tpu.pipeline_mode<synchronous>, transform_indices = @transform_8, window_bounds = array<i64: 3, 64, 64>}, {pipeline_mode = #tpu.pipeline_mode<synchronous>, transform_indices = @transform_9, window_bounds = array<i64: 1, 64>}, {pipeline_mode = #tpu.pipeline_mode<synchronous>, transform_indices = @transform_10, window_bounds = array<i64: 64, 128>}, {pipeline_mode = #tpu.pipeline_mode<synchronous>, transform_indices = @transform_11, window_bounds = array<i64: 1, 128>}, {transform_indices = @transform_12, window_bounds = array<i64: 128, 128>}]} {
    %c0 = arith.constant 0 : index
    %c0_0 = arith.constant 0 : index
    %0 = vector.load %arg1[%c0, %c0_0] : memref<128x256xbf16, #tpu.memory_space<vmem>>, vector<128x256xbf16>
    %c0_1 = arith.constant 0 : index
    %c0_2 = arith.constant 0 : index
    %1 = vector.load %arg3[%c0_1, %c0_2] : memref<256x64xbf16, #tpu.memory_space<vmem>>, vector<256x64xbf16>
    %cst = arith.constant dense<0.000000e+00> : vector<128x64xf32>
    %2 = tpu.matmul %0, %1, %cst {dimension_numbers = #tpu.dot_dimension_numbers<[1], [0], [0], [1], [0, 0, 1, 1], [], []>} : vector<128x256xbf16>, vector<256x64xbf16>, vector<128x64xf32> -> vector<128x64xf32>
    %c0_3 = arith.constant 0 : index
    %c0_4 = arith.constant 0 : index
    %3 = vector.load %arg4[%c0_3, %c0_4] : memref<1x64xf32, #tpu.memory_space<vmem>>, vector<1x64xf32>
    %4 = vector.broadcast %3 : vector<1x64xf32> to vector<128x64xf32>
    %5 = arith.addf %2, %4 : vector<128x64xf32>
    %cst_5 = arith.constant 0.000000e+00 : f32
    %6 = vector.broadcast %cst_5 : f32 to vector<128x64xf32>
    %7 = arith.maximumf %5, %6 : vector<128x64xf32>
    %8 = arith.truncf %7 : vector<128x64xf32> to vector<128x64xbf16>
    %c0_6 = arith.constant 0 : index
    %c0_7 = arith.constant 0 : index
    %9 = vector.load %arg5[%c0_6, %c0_7] : memref<64x64xbf16, #tpu.memory_space<vmem>>, vector<64x64xbf16>
    %cst_8 = arith.constant dense<0.000000e+00> : vector<128x64xf32>
    %10 = tpu.matmul %8, %9, %cst_8 {dimension_numbers = #tpu.dot_dimension_numbers<[1], [0], [0], [1], [0, 0, 1, 1], [], []>} : vector<128x64xbf16>, vector<64x64xbf16>, vector<128x64xf32> -> vector<128x64xf32>
    %c0_9 = arith.constant 0 : index
    %c0_10 = arith.constant 0 : index
    %11 = vector.load %arg6[%c0_9, %c0_10] : memref<1x64xf32, #tpu.memory_space<vmem>>, vector<1x64xf32>
    %12 = vector.broadcast %11 : vector<1x64xf32> to vector<128x64xf32>
    %13 = arith.addf %10, %12 : vector<128x64xf32>
    %cst_11 = arith.constant 0.000000e+00 : f32
    %14 = vector.broadcast %cst_11 : f32 to vector<128x64xf32>
    %15 = arith.maximumf %13, %14 : vector<128x64xf32>
    %c0_12 = arith.constant 0 : index
    %c0_13 = arith.constant 0 : index
    %16 = vector.load %arg2[%c0_12, %c0_13] : memref<128x1xf32, #tpu.memory_space<vmem>>, vector<128x1xf32>
    %17 = vector.broadcast %16 : vector<128x1xf32> to vector<128x64xf32>
    %18 = arith.mulf %15, %17 : vector<128x64xf32>
    %19 = arith.truncf %18 : vector<128x64xf32> to vector<128x64xbf16>
    %c0_14 = arith.constant 0 : index
    %c0_15 = arith.constant 0 : index
    %20 = vector.load %arg7[%c0_14, %c0_15] : memref<128x128xbf16, #tpu.memory_space<vmem>>, vector<128x128xbf16>
    %cst_16 = arith.constant dense<0.000000e+00> : vector<128x64xf32>
    %21 = tpu.matmul %20, %19, %cst_16 {dimension_numbers = #tpu.dot_dimension_numbers<[1], [0], [0], [1], [0, 0, 1, 1], [], []>} : vector<128x128xbf16>, vector<128x64xbf16>, vector<128x64xf32> -> vector<128x64xf32>
    %22 = arith.truncf %21 : vector<128x64xf32> to vector<128x64xbf16>
    %c0_17 = arith.constant 0 : index
    %c0_18 = arith.constant 0 : index
    %23 = vector.load %arg8[%c0_17, %c0_18] : memref<128x128xbf16, #tpu.memory_space<vmem>>, vector<128x128xbf16>
    %cst_19 = arith.constant dense<0.000000e+00> : vector<128x64xf32>
    %24 = tpu.matmul %23, %19, %cst_19 {dimension_numbers = #tpu.dot_dimension_numbers<[1], [0], [0], [1], [0, 0, 1, 1], [], []>} : vector<128x128xbf16>, vector<128x64xbf16>, vector<128x64xf32> -> vector<128x64xf32>
    %25 = arith.truncf %24 : vector<128x64xf32> to vector<128x64xbf16>
    %c0_20 = arith.constant 0 : index
    %c0_21 = arith.constant 0 : index
    %c0_22 = arith.constant 0 : index
    %26 = vector.load %arg9[%c0_20, %c0_21, %c0_22] : memref<3x64x64xbf16, #tpu.memory_space<vmem>>, vector<1x64x64xbf16>
    %27 = vector.shape_cast %26 : vector<1x64x64xbf16> to vector<64x64xbf16>
    %cst_23 = arith.constant dense<0.000000e+00> : vector<128x64xf32>
    %28 = tpu.matmul %22, %27, %cst_23 {dimension_numbers = #tpu.dot_dimension_numbers<[1], [0], [0], [1], [0, 0, 1, 1], [], []>} : vector<128x64xbf16>, vector<64x64xbf16>, vector<128x64xf32> -> vector<128x64xf32>
    %c1 = arith.constant 1 : index
    %c0_24 = arith.constant 0 : index
    %c0_25 = arith.constant 0 : index
    %29 = vector.load %arg9[%c1, %c0_24, %c0_25] : memref<3x64x64xbf16, #tpu.memory_space<vmem>>, vector<1x64x64xbf16>
    %30 = vector.shape_cast %29 : vector<1x64x64xbf16> to vector<64x64xbf16>
    %cst_26 = arith.constant dense<0.000000e+00> : vector<128x64xf32>
    %31 = tpu.matmul %19, %30, %cst_26 {dimension_numbers = #tpu.dot_dimension_numbers<[1], [0], [0], [1], [0, 0, 1, 1], [], []>} : vector<128x64xbf16>, vector<64x64xbf16>, vector<128x64xf32> -> vector<128x64xf32>
    %32 = arith.addf %28, %31 : vector<128x64xf32>
    %c2 = arith.constant 2 : index
    %c0_27 = arith.constant 0 : index
    %c0_28 = arith.constant 0 : index
    %33 = vector.load %arg9[%c2, %c0_27, %c0_28] : memref<3x64x64xbf16, #tpu.memory_space<vmem>>, vector<1x64x64xbf16>
    %34 = vector.shape_cast %33 : vector<1x64x64xbf16> to vector<64x64xbf16>
    %cst_29 = arith.constant dense<0.000000e+00> : vector<128x64xf32>
    %35 = tpu.matmul %25, %34, %cst_29 {dimension_numbers = #tpu.dot_dimension_numbers<[1], [0], [0], [1], [0, 0, 1, 1], [], []>} : vector<128x64xbf16>, vector<64x64xbf16>, vector<128x64xf32> -> vector<128x64xf32>
    %36 = arith.addf %32, %35 : vector<128x64xf32>
    %c0_30 = arith.constant 0 : index
    %c0_31 = arith.constant 0 : index
    %37 = vector.load %arg10[%c0_30, %c0_31] : memref<1x64xf32, #tpu.memory_space<vmem>>, vector<1x64xf32>
    %38 = vector.broadcast %37 : vector<1x64xf32> to vector<128x64xf32>
    %39 = arith.addf %36, %38 : vector<128x64xf32>
    %cst_32 = arith.constant 0.000000e+00 : f32
    %40 = vector.broadcast %cst_32 : f32 to vector<128x64xf32>
    %41 = arith.maximumf %39, %40 : vector<128x64xf32>
    %42 = arith.truncf %41 : vector<128x64xf32> to vector<128x64xbf16>
    %c0_33 = arith.constant 0 : index
    %c0_34 = arith.constant 0 : index
    %43 = vector.load %arg11[%c0_33, %c0_34] : memref<64x128xbf16, #tpu.memory_space<vmem>>, vector<64x128xbf16>
    %cst_35 = arith.constant dense<0.000000e+00> : vector<128x128xf32>
    %44 = tpu.matmul %42, %43, %cst_35 {dimension_numbers = #tpu.dot_dimension_numbers<[1], [0], [0], [1], [0, 0, 1, 1], [], []>} : vector<128x64xbf16>, vector<64x128xbf16>, vector<128x128xf32> -> vector<128x128xf32>
    %c0_36 = arith.constant 0 : index
    %c0_37 = arith.constant 0 : index
    %45 = vector.load %arg12[%c0_36, %c0_37] : memref<1x128xf32, #tpu.memory_space<vmem>>, vector<1x128xf32>
    %46 = vector.broadcast %45 : vector<1x128xf32> to vector<128x128xf32>
    %47 = arith.addf %44, %46 : vector<128x128xf32>
    %c0_38 = arith.constant 0 : index
    %c0_39 = arith.constant 0 : index
    %48 = vector.load %arg13[%c0_38, %c0_39] : memref<128x128xf32, #tpu.memory_space<vmem>>, vector<128x128xf32>
    tpu.vector_store %arg13[%c0_38, %c0_39], %47 {strides = array<i32>} : memref<128x128xf32, #tpu.memory_space<vmem>>, vector<128x128xf32>,
    return
  }
  func.func @transform_0(%arg0: i32) -> (i32, i32) {
    %c0_i32 = arith.constant 0 : i32
    %c0_i32_0 = arith.constant 0 : i32
    return %arg0, %c0_i32 : i32, i32
  }
  func.func @transform_1(%arg0: i32) -> (i32, i32) {
    %c0_i32 = arith.constant 0 : i32
    %c0_i32_0 = arith.constant 0 : i32
    return %arg0, %c0_i32 : i32, i32
  }
  func.func @transform_2(%arg0: i32) -> (i32, i32) {
    %c0_i32 = arith.constant 0 : i32
    %c0_i32_0 = arith.constant 0 : i32
    %c0_i32_1 = arith.constant 0 : i32
    return %c0_i32, %c0_i32_0 : i32, i32
  }
  func.func @transform_3(%arg0: i32) -> (i32, i32) {
    %c0_i32 = arith.constant 0 : i32
    %c0_i32_0 = arith.constant 0 : i32
    %c0_i32_1 = arith.constant 0 : i32
    return %c0_i32, %c0_i32_0 : i32, i32
  }
  func.func @transform_4(%arg0: i32) -> (i32, i32) {
    %c0_i32 = arith.constant 0 : i32
    %c0_i32_0 = arith.constant 0 : i32
    %c0_i32_1 = arith.constant 0 : i32
    return %c0_i32, %c0_i32_0 : i32, i32
  }
  func.func @transform_5(%arg0: i32) -> (i32, i32) {
    %c0_i32 = arith.constant 0 : i32
    %c0_i32_0 = arith.constant 0 : i32
    %c0_i32_1 = arith.constant 0 : i32
    return %c0_i32, %c0_i32_0 : i32, i32
  }
  func.func @transform_6(%arg0: i32) -> (i32, i32) {
    %c0_i32 = arith.constant 0 : i32
    %c0_i32_0 = arith.constant 0 : i32
    %c0_i32_1 = arith.constant 0 : i32
    return %c0_i32, %c0_i32_0 : i32, i32
  }
  func.func @transform_7(%arg0: i32) -> (i32, i32) {
    %c0_i32 = arith.constant 0 : i32
    %c0_i32_0 = arith.constant 0 : i32
    %c0_i32_1 = arith.constant 0 : i32
    return %c0_i32, %c0_i32_0 : i32, i32
  }
  func.func @transform_8(%arg0: i32) -> (i32, i32, i32) {
    %c0_i32 = arith.constant 0 : i32
    %c0_i32_0 = arith.constant 0 : i32
    %c0_i32_1 = arith.constant 0 : i32
    %c0_i32_2 = arith.constant 0 : i32
    return %c0_i32, %c0_i32_0, %c0_i32_1 : i32, i32, i32
  }
  func.func @transform_9(%arg0: i32) -> (i32, i32) {
    %c0_i32 = arith.constant 0 : i32
    %c0_i32_0 = arith.constant 0 : i32
    %c0_i32_1 = arith.constant 0 : i32
    return %c0_i32, %c0_i32_0 : i32, i32
  }
  func.func @transform_10(%arg0: i32) -> (i32, i32) {
    %c0_i32 = arith.constant 0 : i32
    %c0_i32_0 = arith.constant 0 : i32
    %c0_i32_1 = arith.constant 0 : i32
    return %c0_i32, %c0_i32_0 : i32, i32
  }
  func.func @transform_11(%arg0: i32) -> (i32, i32) {
    %c0_i32 = arith.constant 0 : i32
    %c0_i32_0 = arith.constant 0 : i32
    %c0_i32_1 = arith.constant 0 : i32
    return %c0_i32, %c0_i32_0 : i32, i32
  }
  func.func @transform_12(%arg0: i32) -> (i32, i32) {
    %c0_i32 = arith.constant 0 : i32
    %c0_i32_0 = arith.constant 0 : i32
    return %arg0, %c0_i32 : i32, i32
  }
}

</mosaic_0001>

<bundles_post_ra>
// kernel: pyramid_occupancy_network.1
= control target key start
LH: loop header
LB: loop body
LE: loop exit
PB: predicated region body
PF: predicated region fallthrough
CT: control target
= control target key end

     0   :  { %v2288_v36 = vmov 0   ;;  %vm433_vm0 = vcmask 523264   ;;  %s2833_s2 = inlined_call_operand.vmem [shape: bf16[256,64], index: 2, kind: input, shape index: {}]   ;;  %s2834_s0 = inlined_call_operand.vmem [shape: bf16[128,256], index: 0, kind: input, shape index: {}]   ;;  %s2835_s4 = inlined_call_operand.vmem [shape: bf16[64,64], index: 4, kind: input, shape index: {}]   ;;  %s2836_s1 = inlined_call_operand.vmem [shape: f32[128,1], index: 1, kind: input, shape index: {}]   ;;  %s2837_s3 = inlined_call_operand.vmem [shape: f32[1,64], index: 3, kind: input, shape index: {}]   ;;  %s2838_s8 = inlined_call_operand.vmem [shape: bf16[3,64,64], index: 8, kind: input, shape index: {}]   ;;  %s2839_s6 = inlined_call_operand.vmem [shape: bf16[128,128], index: 6, kind: input, shape index: {}]   ;;  %s2840_s7 = inlined_call_operand.vmem [shape: bf16[128,128], index: 7, kind: input, shape index: {}]   ;;  %s2841_s5 = inlined_call_operand.vmem [shape: f32[1,64], index: 5, kind: input, shape index: {}]   ;;  %s2842_s10 = inlined_call_operand.vmem [shape: bf16[64,128], index: 10, kind: input, shape index: {}]   ;;  %s2843_s9 = inlined_call_operand.vmem [shape: f32[1,64], index: 9, kind: input, shape index: {}]   ;;  %s2844_s11 = inlined_call_operand.vmem [shape: f32[1,128], index: 11, kind: input, shape index: {}]   ;;  %s2845_s12 = inlined_call_operand.vmem [shape: f32[128,128], index: 12, kind: output, shape index: {}]  }
   0x1   :  { %v2212_v0 = vld [vmem:[%s2833_s2 + $0x78] sm:$0xff]   ;;  %v2214_v2 = vld [vmem:[%s2833_s2 + $0x70] sm:$0xff]   ;;  %v2216_v4 = vld [vmem:[%s2833_s2 + $0x68] sm:$0xff]   ;;  %2210 = vset.pattern.permute.xlu0 %v2288_v36  ;;  %2211 = vset.pattern.permute.xlu1 %v2288_v36 }
   0x2   :  { %v2213_v1 = vld [vmem:[%s2833_s2 + $0x38] sm:$0xff]   ;;  %1861 = vmatprep.subr.bf16.mxu0 %v2212_v0  ;;  %v2215_v3 = vld [vmem:[%s2833_s2 + $0x30] sm:$0xff]   ;;  %v2217_v5 = vld [vmem:[%s2833_s2 + $0x28] sm:$0xff]  }
   0x3   :  { %1862 = vmatpush3.bf16.msra.mxu0 %v2213_v1  ;;  %v2218_v6 = vld [vmem:[%s2833_s2 + $0x60] sm:$0xff]   ;;  %v2220_v8 = vld [vmem:[%s2833_s2 + $0x58] sm:$0xff]   ;;  %v2222_v10 = vld [vmem:[%s2833_s2 + $0x50] sm:$0xff]  }
   0x4   :  { %1863 = vmatprep.subr.bf16.mxu0 %v2214_v2  ;;  %v2219_v7 = vld [vmem:[%s2833_s2 + $0x20] sm:$0xff]   ;;  %v2221_v9 = vld [vmem:[%s2833_s2 + $0x18] sm:$0xff]   ;;  %v2223_v12 = vld [vmem:[%s2833_s2 + $0x10] sm:$0xff]  }
   0x5   :  { %v2230_v11 = vld [vmem:[%s2834_s0 + $0x4] ss:$8 sps:$4 sm:$0xff]   ;;  %v2228_v17 = vld [vmem:[%s2834_s0] ss:$8 sps:$4 sm:$0xff]   ;;  %v2231_v18 = vld [vmem:[%s2834_s0 + $0x14] ss:$8 sps:$4 sm:$0xff]  }
   0x6   :  { %305 = vmatprep.mubr.bf16.mxu0 %v2230_v11  ;;  %v2224_v13 = vld [vmem:[%s2833_s2 + $0x48] sm:$0xff]   ;;  %v2226_v15 = vld [vmem:[%s2833_s2 + $0x40] sm:$0xff]   ;;  %v2233_v19 = vld [vmem:[%s2834_s0 + $0x10] ss:$8 sps:$4 sm:$0xff]  }
   0x7   :  { %1864 = vmatpush3.bf16.msra.mxu0 %v2215_v3  ;;  %v2225_v14 = vld [vmem:[%s2833_s2 + $0x8] sm:$0xff]   ;;  %v2227_v16 = vld [vmem:[%s2833_s2] sm:$0xff]   ;;  %v2237_v22 = vld [vmem:[%s2834_s0 + $0x34] ss:$8 sps:$4 sm:$0xff]  }
   0x8   :  { %1865 = vmatprep.subr.bf16.mxu0 %v2216_v4  ;;  %v2234_v20 = vld [vmem:[%s2834_s0 + $0x24] ss:$8 sps:$4 sm:$0xff]   ;;  %v2236_v21 = vld [vmem:[%s2834_s0 + $0x20] ss:$8 sps:$4 sm:$0xff]   ;;  %v2239_v23 = vld [vmem:[%s2834_s0 + $0x30] ss:$8 sps:$4 sm:$0xff]  }
   0x9   :  { %v2240_v24 = vld [vmem:[%s2834_s0 + $0x44] ss:$8 sps:$4 sm:$0xff]   ;;  %v2242_v25 = vld [vmem:[%s2834_s0 + $0x40] ss:$8 sps:$4 sm:$0xff]   ;;  %v2243_v26 = vld [vmem:[%s2834_s0 + $0x54] ss:$8 sps:$4 sm:$0xff]  }
   0xa   :  { %v2245_v27 = vld [vmem:[%s2834_s0 + $0x50] ss:$8 sps:$4 sm:$0xff]   ;;  %v2246_v28 = vld [vmem:[%s2834_s0 + $0x64] ss:$8 sps:$4 sm:$0xff]   ;;  %v2248_v29 = vld [vmem:[%s2834_s0 + $0x60] ss:$8 sps:$4 sm:$0xff]  }
   0xb   :  { %1866 = vmatpush3.bf16.msra.mxu0 %v2217_v5  ;;  %v2249_v30 = vld [vmem:[%s2834_s0 + $0x74] ss:$8 sps:$4 sm:$0xff]   ;;  %v2251_v31 = vld [vmem:[%s2834_s0 + $0x70] ss:$8 sps:$4 sm:$0xff]   ;;  %v2254_v34 = vld [vmem:[%s2835_s4 + $0x8] sm:$0xff]  }
   0xc   :  { %1867 = vmatprep.subr.bf16.mxu0 %v2218_v6  ;;  %v2252_v32 = vld [vmem:[%s2835_s4 + $0x18] sm:$0xff]   ;;  %v2253_v33 = vld [vmem:[%s2835_s4 + $0x10] sm:$0xff]   ;;  %v2255_v35 = vld [vmem:[%s2835_s4] sm:$0xff]  }
   0xd   :  { %2017 = vmatprep.subr.bf16.mxu1 %v2252_v32  ;;  %v585_v37 = vld [vmem:[%s2836_s1 + $0x70] sm:$0xff]  ;;  %v586_v38 = vld [vmem:[%s2836_s1 + $0x78] sm:$0xff]  ;;  %v583_v39 = vld [vmem:[%s2836_s1 + $0x60] sm:$0xff] }
   0xe   :  { %2018 = vmatpush3.bf16.msra.mxu1 %v2252_v32  ;;  %659 = vperm.xlu0 %2210, %v585_v37   ;;  %v584_v40 = vld [vmem:[%s2836_s1 + $0x68] sm:$0xff]  ;;  %v581_v41 = vld [vmem:[%s2836_s1 + $0x50] sm:$0xff]  ;;  %v582_v42 = vld [vmem:[%s2836_s1 + $0x58] sm:$0xff] }
   0xf   :  { %1868 = vmatpush3.bf16.msra.mxu0 %v2219_v7  ;;  %2019 = vmatprep.subr.bf16.mxu1 %v2253_v33  ;;  %v579_v43 = vld [vmem:[%s2836_s1 + $0x40] sm:$0xff]  ;;  %v580_v44 = vld [vmem:[%s2836_s1 + $0x48] sm:$0xff]  ;;  %v577_v45 = vld [vmem:[%s2836_s1 + $0x30] sm:$0xff] }
  0x10   :  { %1869 = vmatprep.subr.bf16.mxu0 %v2220_v8  ;;  %649 = vperm.xlu1 %2211, %v583_v39   ;;  %v578_v46 = vld [vmem:[%s2836_s1 + $0x38] sm:$0xff]  ;;  %v575_v47 = vld [vmem:[%s2836_s1 + $0x20] sm:$0xff]  ;;  %v576_v48 = vld [vmem:[%s2836_s1 + $0x28] sm:$0xff] }
  0x11   :  { %v573_v49 = vld [vmem:[%s2836_s1 + $0x10] sm:$0xff]  ;;  %v574_v50 = vld [vmem:[%s2836_s1 + $0x18] sm:$0xff]  ;;  %v571_v51 = vld [vmem:[%s2836_s1] sm:$0xff] }
  0x12   :  { %2020 = vmatpush3.bf16.msra.mxu1 %v2253_v33  ;;  %664 = vperm.xlu0 %2210, %v586_v38   ;;  %v572_v52 = vld [vmem:[%s2836_s1 + $0x8] sm:$0xff]  ;;  %v2513_v56 = vld [vmem:[%s2837_s3] ss:$0 sm:$0xff] }
  0x13   :  { %1870 = vmatpush3.bf16.msra.mxu0 %v2221_v9  ;;  %2021 = vmatprep.subr.bf16.mxu1 %v2254_v34 }
  0x14   :  { %1871 = vmatprep.subr.bf16.mxu0 %v2222_v10  ;;  %654 = vperm.xlu1 %2211, %v584_v40  }
  0x16   :  { %2022 = vmatpush3.bf16.msra.mxu1 %v2254_v34  ;;  %639 = vperm.xlu0 %2210, %v581_v41  }
  0x17   :  { %1872 = vmatpush3.bf16.msra.mxu0 %v2223_v12  ;;  %2023 = vmatprep.subr.bf16.mxu1 %v2255_v35 }
  0x18   :  { %1873 = vmatprep.subr.bf16.mxu0 %v2224_v13  ;;  %644 = vperm.xlu1 %2211, %v582_v42  }
  0x1a   :  { %2024 = vmatpush3.bf16.msra.mxu1 %v2255_v35  ;;  %629 = vperm.xlu0 %2210, %v579_v43  }
  0x1b   :  { %1874 = vmatpush3.bf16.msra.mxu0 %v2225_v14 }
  0x1c   :  { %1875 = vmatprep.subr.bf16.mxu0 %v2226_v15  ;;  %634 = vperm.xlu1 %2211, %v580_v44  }
  0x1e   :  { %619 = vperm.xlu0 %2210, %v577_v45  }
  0x1f   :  { %1876 = vmatpush3.bf16.msra.mxu0 %v2227_v16 }
  0x20   :  { %624 = vperm.xlu1 %2211, %v578_v46  }
  0x22   :  { %306 = vmatmul.mubr.bf16.vlgmr.msra.gmra.mxu0 %v2228_v17  ;;  %609 = vperm.xlu0 %2210, %v575_v47  }
  0x23   :  { %313 = vmatprep.mubr.bf16.mxu0 %v2231_v18 }
  0x24   :  { %614 = vperm.xlu1 %2211, %v576_v48  }
  0x26   :  { %599 = vperm.xlu0 %2210, %v573_v49  }
  0x28   :  { %604 = vperm.xlu1 %2211, %v574_v50  }
  0x2a   :  { %314 = vmatmul.mubr.bf16.gmra.mxu0 %v2233_v19  ;;  %589 = vperm.xlu0 %2210, %v571_v51  }
  0x2b   :  { %321 = vmatprep.mubr.bf16.mxu0 %v2234_v20 }
  0x2c   :  { %594 = vperm.xlu1 %2211, %v572_v52  }
  0x32   :  { %322 = vmatmul.mubr.bf16.gmra.mxu0 %v2236_v21 }
  0x33   :  { %329 = vmatprep.mubr.bf16.mxu0 %v2237_v22 }
  0x3a   :  { %330 = vmatmul.mubr.bf16.gmra.mxu0 %v2239_v23 }
  0x3b   :  { %337 = vmatprep.mubr.bf16.mxu0 %v2240_v24 }
  0x42   :  { %338 = vmatmul.mubr.bf16.gmra.mxu0 %v2242_v25 }
  0x43   :  { %345 = vmatprep.mubr.bf16.mxu0 %v2243_v26 }
  0x4a   :  { %346 = vmatmul.mubr.bf16.gmra.mxu0 %v2245_v27 }
  0x4b   :  { %353 = vmatprep.mubr.bf16.mxu0 %v2246_v28 }
  0x52   :  { %354 = vmatmul.mubr.bf16.gmra.mxu0 %v2248_v29 }
  0x53   :  { %361 = vmatprep.mubr.bf16.mxu0 %v2249_v30 }
  0x5a   :  { %362 = vmatmul.mubr.bf16.gmra.mxu0 %v2251_v31 }
  0xe2   :  { %v1877_v53 = vpop.f32.mrf.mxu0 }
  0xe4   :  { %v1878_v54 = vpop.f32.mrf.mxu0 }
  0xe5   :  { %v1879_v55 = vadd.f32 %v1878_v54, %v1877_v53 }
  0xe6   :  { %v1880_v57 = vpop.f32.mrf.mxu0 }
  0xe7   :  { %v308_v59 = vadd.f32 %v1879_v55, %v2513_v56 }
  0xe8   :  { %v1881_v58 = vpop.f32.mrf.mxu0 }
  0xe9   :  { %v1882_v60 = vadd.f32 %v1881_v58, %v1880_v57  ;;  %v370_v0 = vmax.f32 %v308_v59, 0.0 }
  0xea   :  { %v1883_v61 = vpop.f32.mrf.mxu0 }
  0xeb   :  { %v311_v62 = vadd.f32 %v1882_v60, %v2513_v56 }
  0xec   :  { %v1884_v63 = vpop.f32.mrf.mxu0 }
  0xed   :  { %v371_v1 = vmax.f32 %v311_v62, 0.0  ;;  %v1885_v2 = vadd.f32 %v1884_v63, %v1883_v61 }
  0xee   :  { %v1886_v3 = vpop.f32.mrf.mxu0 }
  0xef   :  { %v386_v4 = vpack.c.bf16 %v371_v1, %v370_v0  ;;  %v316_v6 = vadd.f32 %v1885_v2, %v2513_v56 }
  0xf0   :  { %v1887_v5 = vpop.f32.mrf.mxu0 }
  0xf1   :  { %v1888_v7 = vadd.f32 %v1887_v5, %v1886_v3  ;;  %2025 = vmatprep.mubr.msk.bf16.mxu1 %vm433_vm0, %v386_v4  ;;  %v372_v11 = vmax.f32 %v316_v6, 0.0 }
  0xf2   :  { %v1889_v8 = vpop.f32.mrf.mxu0 }
  0xf3   :  { %v319_v9 = vadd.f32 %v1888_v7, %v2513_v56 }
  0xf4   :  { %v1890_v10 = vpop.f32.mrf.mxu0 }
  0xf5   :  { %v373_v12 = vmax.f32 %v319_v9, 0.0  ;;  %v1891_v13 = vadd.f32 %v1890_v10, %v1889_v8 }
  0xf6   :  { %v1892_v14 = vpop.f32.mrf.mxu0 }
  0xf7   :  { %v387_v15 = vpack.c.bf16 %v373_v12, %v372_v11  ;;  %v324_v17 = vadd.f32 %v1891_v13, %v2513_v56 }
  0xf8   :  { %v1893_v16 = vpop.f32.mrf.mxu0 }
  0xf9   :  { %v1894_v18 = vadd.f32 %v1893_v16, %v1892_v14  ;;  %2026 = vmatmul.mubr.msk.bf16.vlgmr.msra.gmra.mxu1 %vm433_vm0, %v387_v15  ;;  %v374_v22 = vmax.f32 %v324_v17, 0.0  ;;  %v2256_v15 = vld [vmem:[%s2838_s8 + $0x38] sm:$0xff]   ;;  %v2257_v16 = vld [vmem:[%s2838_s8 + $0x30] sm:$0xff]   ;;  %v2259_v17 = vld [vmem:[%s2838_s8 + $0x20] sm:$0xff]  }
  0xfa   :  { %v1895_v19 = vpop.f32.mrf.mxu0  ;;  %2105 = vmatprep.subr.bf16.mxu0 %v2256_v15 }
  0xfb   :  { %v327_v20 = vadd.f32 %v1894_v18, %v2513_v56  ;;  %2106 = vmatpush3.bf16.msra.mxu0 %v2256_v15  ;;  %v2260_v18 = vld [vmem:[%s2839_s6] sm:$0xff]  }
  0xfc   :  { %v1896_v21 = vpop.f32.mrf.mxu0  ;;  %2107 = vmatprep.subr.bf16.mxu0 %v2257_v16 }
  0xfd   :  { %v375_v23 = vmax.f32 %v327_v20, 0.0  ;;  %v1897_v24 = vadd.f32 %v1896_v21, %v1895_v19  ;;  %v2554_v19 = vpop.permute.xlu0 %659  ;;  %v2556_v20 = vpop.permute.xlu1 %649 }
  0xfe   :  { %v1898_v25 = vpop.f32.mrf.mxu0 }
  0xff   :  { %v388_v26 = vpack.c.bf16 %v375_v23, %v374_v22  ;;  %v332_v28 = vadd.f32 %v1897_v24, %v2513_v56  ;;  %2108 = vmatpush3.bf16.msra.mxu0 %v2257_v16 }
 0x100   :  { %v1899_v27 = vpop.f32.mrf.mxu0 }
 0x101   :  { %v1900_v29 = vadd.f32 %v1899_v27, %v1898_v25  ;;  %2029 = vmatprep.mubr.msk.bf16.mxu1 %vm433_vm0, %v388_v26  ;;  %v376_v33 = vmax.f32 %v332_v28, 0.0  ;;  %v2558_v21 = vpop.permute.xlu0 %664  ;;  %v2560_v22 = vpop.permute.xlu1 %654 }
 0x102   :  { %v1901_v30 = vpop.f32.mrf.mxu0 }
 0x103   :  { %v335_v31 = vadd.f32 %v1900_v29, %v2513_v56 }
 0x104   :  { %v1902_v32 = vpop.f32.mrf.mxu0 }
 0x105   :  { %v377_v34 = vmax.f32 %v335_v31, 0.0  ;;  %v1903_v35 = vadd.f32 %v1902_v32, %v1901_v30  ;;  %v2562_v23 = vpop.permute.xlu0 %639  ;;  %v2564_v24 = vpop.permute.xlu1 %644  ;;  %v2573_v32 = vld [vmem:[%s2841_s5] ss:$0 sm:$0xff] }
 0x106   :  { %v1904_v36 = vpop.f32.mrf.mxu0 }
 0x107   :  { %v389_v37 = vpack.c.bf16 %v377_v34, %v376_v33  ;;  %v340_v39 = vadd.f32 %v1903_v35, %v2513_v56 }
 0x108   :  { %v1905_v38 = vpop.f32.mrf.mxu0 }
 0x109   :  { %v1906_v40 = vadd.f32 %v1905_v38, %v1904_v36  ;;  %2030 = vmatmul.mubr.msk.bf16.gmra.mxu1 %vm433_vm0, %v389_v37  ;;  %v378_v44 = vmax.f32 %v340_v39, 0.0  ;;  %v2566_v25 = vpop.permute.xlu0 %629  ;;  %v2568_v26 = vpop.permute.xlu1 %634 }
 0x10a   :  { %v1907_v41 = vpop.f32.mrf.mxu0 }
 0x10b   :  { %v343_v42 = vadd.f32 %v1906_v40, %v2513_v56 }
 0x10c   :  { %v1908_v43 = vpop.f32.mrf.mxu0 }
 0x10d   :  { %v379_v45 = vmax.f32 %v343_v42, 0.0  ;;  %v1909_v46 = vadd.f32 %v1908_v43, %v1907_v41  ;;  %v620_v27 = vpop.permute.xlu0 %619  ;;  %v625_v28 = vpop.permute.xlu1 %624 }
 0x10e   :  { %v1910_v47 = vpop.f32.mrf.mxu0 }
 0x10f   :  { %v390_v48 = vpack.c.bf16 %v379_v45, %v378_v44  ;;  %v348_v50 = vadd.f32 %v1909_v46, %v2513_v56 }
 0x110   :  { %v1911_v49 = vpop.f32.mrf.mxu0 }
 0x111   :  { %v1912_v51 = vadd.f32 %v1911_v49, %v1910_v47  ;;  %2033 = vmatprep.mubr.msk.bf16.mxu1 %vm433_vm0, %v390_v48  ;;  %v380_v55 = vmax.f32 %v348_v50, 0.0  ;;  %v610_v29 = vpop.permute.xlu0 %609  ;;  %v615_v30 = vpop.permute.xlu1 %614 }
 0x112   :  { %v1913_v52 = vpop.f32.mrf.mxu0 }
 0x113   :  { %v351_v53 = vadd.f32 %v1912_v51, %v2513_v56 }
 0x114   :  { %v1914_v54 = vpop.f32.mrf.mxu0 }
 0x115   :  { %v381_v57 = vmax.f32 %v351_v53, 0.0  ;;  %v1915_v58 = vadd.f32 %v1914_v54, %v1913_v52  ;;  %v600_v33 = vpop.permute.xlu0 %599  ;;  %v605_v35 = vpop.permute.xlu1 %604 }
 0x116   :  { %v1916_v59 = vpop.f32.mrf.mxu0 }
 0x117   :  { %v391_v60 = vpack.c.bf16 %v381_v57, %v380_v55  ;;  %v356_v62 = vadd.f32 %v1915_v58, %v2513_v56 }
 0x118   :  { %v1917_v61 = vpop.f32.mrf.mxu0 }
 0x119   :  { %v1918_v63 = vadd.f32 %v1917_v61, %v1916_v59  ;;  %2034 = vmatmul.mubr.msk.bf16.gmra.mxu1 %vm433_vm0, %v391_v60  ;;  %v382_v3 = vmax.f32 %v356_v62, 0.0  ;;  %v590_v45 = vpop.permute.xlu0 %589  ;;  %v595_v46 = vpop.permute.xlu1 %594 }
 0x11a   :  { %v1919_v0 = vpop.f32.mrf.mxu0 }
 0x11b   :  { %v359_v1 = vadd.f32 %v1918_v63, %v2513_v56 }
 0x11c   :  { %v1920_v2 = vpop.f32.mrf.mxu0 }
 0x11d   :  { %v383_v4 = vmax.f32 %v359_v1, 0.0  ;;  %v1921_v5 = vadd.f32 %v1920_v2, %v1919_v0 }
 0x11e   :  { %v1922_v6 = vpop.f32.mrf.mxu0 }
 0x11f   :  { %v392_v7 = vpack.c.bf16 %v383_v4, %v382_v3  ;;  %v364_v9 = vadd.f32 %v1921_v5, %v2513_v56 }
 0x120   :  { %v1923_v8 = vpop.f32.mrf.mxu0 }
 0x121   :  { %v1924_v10 = vadd.f32 %v1923_v8, %v1922_v6  ;;  %2037 = vmatprep.mubr.msk.bf16.mxu1 %vm433_vm0, %v392_v7  ;;  %v384_v12 = vmax.f32 %v364_v9, 0.0 }
 0x123   :  { %v367_v11 = vadd.f32 %v1924_v10, %v2513_v56  ;;  %v2258_v56 = vld [vmem:[%s2838_s8 + $0x28] sm:$0xff]  }
 0x124   :  { %2109 = vmatprep.subr.bf16.mxu0 %v2258_v56 }
 0x125   :  { %v385_v13 = vmax.f32 %v367_v11, 0.0  ;;  %2110 = vmatpush3.bf16.msra.mxu0 %v2258_v56 }
 0x126   :  { %2111 = vmatprep.subr.bf16.mxu0 %v2259_v17 }
 0x127   :  { %v393_v14 = vpack.c.bf16 %v385_v13, %v384_v12 }
 0x129   :  { %2038 = vmatmul.mubr.msk.bf16.gmra.mxu1 %vm433_vm0, %v393_v14  ;;  %2112 = vmatpush3.bf16.msra.mxu0 %v2259_v17 }
 0x12a   :  { %2057 = vmatprep.mubr.bf16.mxu1 %v2260_v18 }
 0x1b9   :  { %v2027_v31 = vpop.f32.mrf.mxu1 }
 0x1ba   :  { %v501_v37 = vadd.f32 %v2027_v31, %v2573_v32 }
 0x1bb   :  { %v492_v34 = vpop.f32.mrf.mxu1 }
 0x1bc   :  { %v493_v36 = vadd.f32 %v2573_v32, %v492_v34  ;;  %v557_v44 = vmax.f32 %v501_v37, 0.0 }
 0x1bd   :  { %v2028_v38 = vpop.f32.mrf.mxu1 }
 0x1be   :  { %v504_v39 = vadd.f32 %v2028_v38, %v2573_v32  ;;  %v555_v41 = vmax.f32 %v493_v36, 0.0  ;;  %v669_v51 = vmul.f32 %v600_v33, %v557_v44 }
 0x1bf   :  { %v495_v40 = vpop.f32.mrf.mxu1 }
 0x1c0   :  { %v558_v42 = vmax.f32 %v504_v39, 0.0  ;;  %v496_v43 = vadd.f32 %v2573_v32, %v495_v40  ;;  %v667_v49 = vmul.f32 %v590_v45, %v555_v41 }
 0x1c2   :  { %v556_v47 = vmax.f32 %v496_v43, 0.0  ;;  %v670_v48 = vmul.f32 %v605_v35, %v558_v42 }
 0x1c4   :  { %v668_v50 = vmul.f32 %v595_v46, %v556_v47  ;;  %v2581_v53 = vpack.c.bf16 %v670_v48, %v669_v51  ;;  %v2268_v51 = vld [vmem:[%s2840_s7] sm:$0xff]  }
 0x1c6   :  { %v2579_v52 = vpack.c.bf16 %v668_v50, %v667_v49  ;;  %v2266_v49 = vld [vmem:[%s2839_s6 + $0x30] sm:$0xff]   ;;  %v2267_v50 = vld [vmem:[%s2839_s6 + $0x38] sm:$0xff]  }
 0x1c8   :  { %2113 = vmatprep.mubr.msk.bf16.mxu0 %vm433_vm0, %v2579_v52 }
 0x1c9   :  { %v2031_v54 = vpop.f32.mrf.mxu1  ;;  %2114 = vmatmul.mubr.msk.bf16.vlgmr.msra.gmra.mxu0 %vm433_vm0, %v2581_v53 }
 0x1ca   :  { %v517_v58 = vadd.f32 %v2031_v54, %v2573_v32  ;;  %v2269_v54 = vld [vmem:[%s2840_s7 + $0x8] sm:$0xff]  }
 0x1cb   :  { %v508_v55 = vpop.f32.mrf.mxu1 }
 0x1cc   :  { %v509_v57 = vadd.f32 %v2573_v32, %v508_v55  ;;  %v561_v1 = vmax.f32 %v517_v58, 0.0  ;;  %v2270_v55 = vld [vmem:[%s2840_s7 + $0x10] sm:$0xff]  }
 0x1cd   :  { %v2032_v59 = vpop.f32.mrf.mxu1  ;;  %v2277_v58 = vld [vmem:[%s2838_s8 + $0x10] sm:$0xff]  }
 0x1ce   :  { %v520_v60 = vadd.f32 %v2032_v59, %v2573_v32  ;;  %v559_v62 = vmax.f32 %v509_v57, 0.0  ;;  %v673_v6 = vmul.f32 %v620_v27, %v561_v1  ;;  %v2271_v57 = vld [vmem:[%s2840_s7 + $0x18] sm:$0xff]   ;;  %v2273_v59 = vld [vmem:[%s2840_s7 + $0x28] sm:$0xff]   ;;  %v2281_v1 = vld [vmem:[%s2838_s8 + $0x50] sm:$0xff]  }
 0x1cf   :  { %v511_v61 = vpop.f32.mrf.mxu1 }
 0x1d0   :  { %v562_v63 = vmax.f32 %v520_v60, 0.0  ;;  %v512_v0 = vadd.f32 %v2573_v32, %v511_v61  ;;  %v671_v4 = vmul.f32 %v610_v29, %v559_v62  ;;  %v2274_v60 = vld [vmem:[%s2840_s7 + $0x30] sm:$0xff]   ;;  %v2275_v61 = vld [vmem:[%s2840_s7 + $0x38] sm:$0xff]   ;;  %v2278_v62 = vld [vmem:[%s2838_s8 + $0x8] sm:$0xff]  }
 0x1d2   :  { %v560_v2 = vmax.f32 %v512_v0, 0.0  ;;  %v674_v3 = vmul.f32 %v625_v28, %v562_v63  ;;  %v2279_v63 = vld [vmem:[%s2838_s8] sm:$0xff]   ;;  %v2280_v0 = vld [vmem:[%s2838_s8 + $0x58] sm:$0xff]  }
 0x1d3   :  { %2153 = vmatprep.subr.bf16.mxu0 %v2280_v0 }
 0x1d4   :  { %v672_v5 = vmul.f32 %v615_v30, %v560_v2  ;;  %v2593_v8 = vpack.c.bf16 %v674_v3, %v673_v6  ;;  %2154 = vmatpush3.bf16.msra.mxu0 %v2280_v0  ;;  %v2282_v2 = vld [vmem:[%s2838_s8 + $0x48] sm:$0xff]   ;;  %v2283_v3 = vld [vmem:[%s2838_s8 + $0x40] sm:$0xff]  }
 0x1d5   :  { %2155 = vmatprep.subr.bf16.mxu0 %v2281_v1 }
 0x1d6   :  { %v2591_v7 = vpack.c.bf16 %v672_v5, %v671_v4 }
 0x1d8   :  { %2117 = vmatprep.mubr.msk.bf16.mxu0 %vm433_vm0, %v2591_v7  ;;  %2156 = vmatpush3.bf16.msra.mxu0 %v2281_v1 }
 0x1d9   :  { %v2035_v9 = vpop.f32.mrf.mxu1  ;;  %2118 = vmatmul.mubr.msk.bf16.gmra.mxu0 %vm433_vm0, %v2593_v8  ;;  %2157 = vmatprep.subr.bf16.mxu0 %v2282_v2 }
 0x1da   :  { %v533_v12 = vadd.f32 %v2035_v9, %v2573_v32 }
 0x1db   :  { %v524_v10 = vpop.f32.mrf.mxu1 }
 0x1dc   :  { %v525_v11 = vadd.f32 %v2573_v32, %v524_v10  ;;  %v565_v18 = vmax.f32 %v533_v12, 0.0  ;;  %2158 = vmatpush3.bf16.msra.mxu0 %v2282_v2 }
 0x1dd   :  { %v2036_v13 = vpop.f32.mrf.mxu1  ;;  %2159 = vmatprep.subr.bf16.mxu0 %v2283_v3 }
 0x1de   :  { %v536_v14 = vadd.f32 %v2036_v13, %v2573_v32  ;;  %v563_v16 = vmax.f32 %v525_v11, 0.0  ;;  %v677_v31 = vmul.f32 %v2562_v23, %v565_v18 }
 0x1df   :  { %v527_v15 = vpop.f32.mrf.mxu1 }
 0x1e0   :  { %v566_v56 = vmax.f32 %v536_v14, 0.0  ;;  %v528_v17 = vadd.f32 %v2573_v32, %v527_v15  ;;  %v675_v29 = vmul.f32 %v2566_v25, %v563_v16  ;;  %2160 = vmatpush3.bf16.msra.mxu0 %v2283_v3 }
 0x1e2   :  { %v564_v27 = vmax.f32 %v528_v17, 0.0  ;;  %v678_v28 = vmul.f32 %v2564_v24, %v566_v56 }
 0x1e4   :  { %v676_v30 = vmul.f32 %v2568_v26, %v564_v27  ;;  %v688_v34 = vpack.c.bf16 %v678_v28, %v677_v31 }
 0x1e6   :  { %v687_v33 = vpack.c.bf16 %v676_v30, %v675_v29 }
 0x1e8   :  { %2121 = vmatprep.mubr.msk.bf16.mxu0 %vm433_vm0, %v687_v33 }
 0x1e9   :  { %v2039_v35 = vpop.f32.mrf.mxu1  ;;  %2122 = vmatmul.mubr.msk.bf16.gmra.mxu0 %vm433_vm0, %v688_v34 }
 0x1ea   :  { %v549_v36 = vadd.f32 %v2039_v35, %v2573_v32 }
 0x1eb   :  { %v540_v37 = vpop.f32.mrf.mxu1 }
 0x1ec   :  { %v541_v38 = vadd.f32 %v2573_v32, %v540_v37  ;;  %v569_v24 = vmax.f32 %v549_v36, 0.0 }
 0x1ed   :  { %v2040_v39 = vpop.f32.mrf.mxu1 }
 0x1ee   :  { %v552_v25 = vadd.f32 %v2040_v39, %v2573_v32  ;;  %v567_v26 = vmax.f32 %v541_v38, 0.0  ;;  %v681_v42 = vmul.f32 %v2554_v19, %v569_v24  ;;  %v2261_v19 = vld [vmem:[%s2839_s6 + $0x8] sm:$0xff]  }
 0x1ef   :  { %v543_v40 = vpop.f32.mrf.mxu1 }
 0x1f0   :  { %v570_v41 = vmax.f32 %v552_v25, 0.0  ;;  %v544_v23 = vadd.f32 %v2573_v32, %v543_v40  ;;  %v679_v45 = vmul.f32 %v2556_v20, %v567_v26  ;;  %v2262_v20 = vld [vmem:[%s2839_s6 + $0x10] sm:$0xff]   ;;  %v2265_v32 = vld [vmem:[%s2839_s6 + $0x28] sm:$0xff]  }
 0x1f2   :  { %v682_v43 = vmul.f32 %v2558_v21, %v570_v41  ;;  %v568_v44 = vmax.f32 %v544_v23, 0.0  ;;  %v2263_v21 = vld [vmem:[%s2839_s6 + $0x18] sm:$0xff]  }
 0x1f4   :  { %v690_v46 = vpack.c.bf16 %v682_v43, %v681_v42  ;;  %v680_v47 = vmul.f32 %v2560_v22, %v568_v44  ;;  %v2264_v22 = vld [vmem:[%s2839_s6 + $0x20] sm:$0xff]  }
 0x1f6   :  { %v689_v48 = vpack.c.bf16 %v680_v47, %v679_v45  ;;  %2041 = vmatprep.subr.bf16.mxu1 %v690_v46 }
 0x1f7   :  { %2042 = vmatpush3.bf16.msra.mxu1 %v690_v46 }
 0x1f8   :  { %2043 = vmatprep.subr.bf16.mxu1 %v689_v48  ;;  %2125 = vmatprep.mubr.msk.bf16.mxu0 %vm433_vm0, %v689_v48 }
 0x1f9   :  { %2126 = vmatmul.mubr.msk.bf16.gmra.mxu0 %vm433_vm0, %v690_v46 }
 0x1fb   :  { %2044 = vmatpush3.bf16.msra.mxu1 %v689_v48 }
 0x1fc   :  { %2045 = vmatprep.subr.bf16.mxu1 %v688_v34 }
 0x1ff   :  { %2046 = vmatpush3.bf16.msra.mxu1 %v688_v34 }
 0x200   :  { %2047 = vmatprep.subr.bf16.mxu1 %v687_v33 }
 0x203   :  { %2048 = vmatpush3.bf16.msra.mxu1 %v687_v33 }
 0x204   :  { %2049 = vmatprep.subr.bf16.mxu1 %v2593_v8 }
 0x207   :  { %2050 = vmatpush3.bf16.msra.mxu1 %v2593_v8 }
 0x208   :  { %2051 = vmatprep.subr.bf16.mxu1 %v2591_v7 }
 0x20b   :  { %2052 = vmatpush3.bf16.msra.mxu1 %v2591_v7 }
 0x20c   :  { %2053 = vmatprep.subr.bf16.mxu1 %v2581_v53 }
 0x20f   :  { %2054 = vmatpush3.bf16.msra.mxu1 %v2581_v53 }
 0x210   :  { %2055 = vmatprep.subr.bf16.mxu1 %v2579_v52 }
 0x213   :  { %2056 = vmatpush3.bf16.msra.mxu1 %v2579_v52 }
 0x214   :  { %2073 = vmatprep.subr.bf16.mxu1 %v690_v46 }
 0x216   :  { %2058 = vmatmul.mubr.bf16.vlgmr.msra.gmra.mxu1 %v2261_v19 }
 0x217   :  { %2074 = vmatpush3.bf16.msra.mxu1 %v690_v46  ;;  %2061 = vmatprep.mubr.bf16.mxu1 %v2262_v20 }
 0x218   :  { %2075 = vmatprep.subr.bf16.mxu1 %v689_v48 }
 0x21b   :  { %2076 = vmatpush3.bf16.msra.mxu1 %v689_v48 }
 0x21c   :  { %2077 = vmatprep.subr.bf16.mxu1 %v688_v34 }
 0x21e   :  { %2062 = vmatmul.mubr.bf16.gmra.mxu1 %v2263_v21 }
 0x21f   :  { %2078 = vmatpush3.bf16.msra.mxu1 %v688_v34  ;;  %2065 = vmatprep.mubr.bf16.mxu1 %v2264_v22 }
 0x220   :  { %2079 = vmatprep.subr.bf16.mxu1 %v687_v33 }
 0x223   :  { %2080 = vmatpush3.bf16.msra.mxu1 %v687_v33 }
 0x224   :  { %2081 = vmatprep.subr.bf16.mxu1 %v2593_v8 }
 0x226   :  { %2066 = vmatmul.mubr.bf16.gmra.mxu1 %v2265_v32 }
 0x227   :  { %2082 = vmatpush3.bf16.msra.mxu1 %v2593_v8  ;;  %2069 = vmatprep.mubr.bf16.mxu1 %v2266_v49 }
 0x228   :  { %2083 = vmatprep.subr.bf16.mxu1 %v2591_v7 }
 0x22b   :  { %2084 = vmatpush3.bf16.msra.mxu1 %v2591_v7 }
 0x22c   :  { %2085 = vmatprep.subr.bf16.mxu1 %v2581_v53 }
 0x22e   :  { %2070 = vmatmul.mubr.bf16.gmra.mxu1 %v2267_v50 }
 0x22f   :  { %2086 = vmatpush3.bf16.msra.mxu1 %v2581_v53  ;;  %2089 = vmatprep.mubr.bf16.mxu1 %v2268_v51  ;;  %v2272_v53 = vld [vmem:[%s2840_s7 + $0x20] sm:$0xff]   ;;  %v2284_v51 = vld [vmem:[%s2842_s10 + $0x18] sm:$0xff]  }
 0x230   :  { %2087 = vmatprep.subr.bf16.mxu1 %v2579_v52  ;;  %2177 = vmatprep.subr.bf16.mxu0 %v2284_v51 }
 0x233   :  { %2088 = vmatpush3.bf16.msra.mxu1 %v2579_v52  ;;  %v2276_v52 = vld [vmem:[%s2838_s8 + $0x18] sm:$0xff]  }
 0x234   :  { %2129 = vmatprep.subr.bf16.mxu1 %v2276_v52 }
 0x236   :  { %2090 = vmatmul.mubr.bf16.vlgmr.msra.gmra.mxu1 %v2269_v54  ;;  %v2285_v54 = vld [vmem:[%s2842_s10 + $0x10] sm:$0xff]  }
 0x237   :  { %2093 = vmatprep.mubr.bf16.mxu1 %v2270_v55  ;;  %2130 = vmatpush3.bf16.msra.mxu1 %v2276_v52  ;;  %v2286_v55 = vld [vmem:[%s2842_s10 + $0x8] sm:$0xff]  }
 0x238   :  { %2131 = vmatprep.subr.bf16.mxu1 %v2277_v58 }
 0x23b   :  { %2132 = vmatpush3.bf16.msra.mxu1 %v2277_v58 }
 0x23c   :  { %2133 = vmatprep.subr.bf16.mxu1 %v2278_v62 }
 0x23e   :  { %2094 = vmatmul.mubr.bf16.gmra.mxu1 %v2271_v57  ;;  %v2287_v57 = vld [vmem:[%s2842_s10] sm:$0xff]  }
 0x23f   :  { %2097 = vmatprep.mubr.bf16.mxu1 %v2272_v53  ;;  %2134 = vmatpush3.bf16.msra.mxu1 %v2278_v62 }
 0x240   :  { %2135 = vmatprep.subr.bf16.mxu1 %v2279_v63 }
 0x243   :  { %2136 = vmatpush3.bf16.msra.mxu1 %v2279_v63 }
 0x244   :  { %2201 = vmatprep.subr.bf16.mxu1 %v2284_v51 }
 0x246   :  { %2098 = vmatmul.mubr.bf16.gmra.mxu1 %v2273_v59 }
 0x247   :  { %2101 = vmatprep.mubr.bf16.mxu1 %v2274_v60 }
 0x24e   :  { %2102 = vmatmul.mubr.bf16.gmra.mxu1 %v2275_v61 }
 0x289   :  { %v2115_v53 = vpop.f32.mrf.mxu0 }
 0x28b   :  { %v1128_v52 = vpop.f32.mrf.mxu0 }
 0x28d   :  { %v2116_v58 = vpop.f32.mrf.mxu0 }
 0x28f   :  { %v1131_v59 = vpop.f32.mrf.mxu0 }
 0x299   :  { %v2119_v60 = vpop.f32.mrf.mxu0 }
 0x29b   :  { %v1144_v61 = vpop.f32.mrf.mxu0 }
 0x29d   :  { %v2120_v62 = vpop.f32.mrf.mxu0 }
 0x29f   :  { %v1147_v0 = vpop.f32.mrf.mxu0 }
 0x2a9   :  { %v2732_v2 = vpop.f32.mrf.mxu0 }
 0x2d6   :  { %v2059_v4 = vpop.f32.mrf.mxu1 }
 0x2d8   :  { %v789_v5 = vpop.f32.mrf.mxu1 }
 0x2da   :  { %v2060_v6 = vpop.f32.mrf.mxu1 }
 0x2db   :  { %v853_v9 = vpack.c.bf16 %v2060_v6, %v2059_v4  ;;  %v1160_v4 = vpop.f32.mrf.mxu0 }
 0x2dc   :  { %v792_v7 = vpop.f32.mrf.mxu1 }
 0x2dd   :  { %v852_v8 = vpack.c.bf16 %v792_v7, %v789_v5  ;;  %v2734_v6 = vpop.f32.mrf.mxu0 }
 0x2de   :  { %v2063_v10 = vpop.f32.mrf.mxu1 }
 0x2df   :  { %2137 = vmatprep.mubr.msk.bf16.mxu1 %vm433_vm0, %v852_v8  ;;  %v2736_v8 = vpop.f32.mrf.mxu0 }
 0x2e0   :  { %v805_v11 = vpop.f32.mrf.mxu1  ;;  %2138 = vmatmul.mubr.msk.bf16.vlgmr.msra.gmra.mxu1 %vm433_vm0, %v853_v9 }
 0x2e1   :  { %2205 = vmatpush3.bf16.msra.mxu1 %v2284_v51  ;;  %v2738_v9 = vpop.f32.mrf.mxu0 }
 0x2e2   :  { %v2064_v12 = vpop.f32.mrf.mxu1  ;;  %2202 = vmatprep.subr.bf16.mxu1 %v2285_v54 }
 0x2e3   :  { %v855_v15 = vpack.c.bf16 %v2064_v12, %v2063_v10 }
 0x2e4   :  { %v808_v13 = vpop.f32.mrf.mxu1 }
 0x2e5   :  { %v854_v14 = vpack.c.bf16 %v808_v13, %v805_v11  ;;  %2206 = vmatpush3.bf16.msra.mxu1 %v2285_v54  ;;  %v2740_v11 = vpop.f32.mrf.mxu0 }
 0x2e6   :  { %v2067_v16 = vpop.f32.mrf.mxu1  ;;  %2203 = vmatprep.subr.bf16.mxu1 %v2286_v55 }
 0x2e7   :  { %2141 = vmatprep.mubr.msk.bf16.mxu1 %vm433_vm0, %v854_v14  ;;  %v2742_v13 = vpop.f32.mrf.mxu0 }
 0x2e8   :  { %v821_v56 = vpop.f32.mrf.mxu1  ;;  %2142 = vmatmul.mubr.msk.bf16.gmra.mxu1 %vm433_vm0, %v855_v15 }
 0x2e9   :  { %2207 = vmatpush3.bf16.msra.mxu1 %v2286_v55  ;;  %v2744_v15 = vpop.f32.mrf.mxu0 }
 0x2ea   :  { %v2068_v17 = vpop.f32.mrf.mxu1  ;;  %2204 = vmatprep.subr.bf16.mxu1 %v2287_v57 }
 0x2eb   :  { %v857_v28 = vpack.c.bf16 %v2068_v17, %v2067_v16 }
 0x2ec   :  { %v824_v18 = vpop.f32.mrf.mxu1 }
 0x2ed   :  { %v856_v27 = vpack.c.bf16 %v824_v18, %v821_v56  ;;  %2208 = vmatpush3.bf16.msra.mxu1 %v2287_v57 }
 0x2ee   :  { %v2071_v29 = vpop.f32.mrf.mxu1 }
 0x2ef   :  { %2145 = vmatprep.mubr.msk.bf16.mxu1 %vm433_vm0, %v856_v27 }
 0x2f0   :  { %v837_v30 = vpop.f32.mrf.mxu1  ;;  %2146 = vmatmul.mubr.msk.bf16.gmra.mxu1 %vm433_vm0, %v857_v28 }
 0x2f2   :  { %v2072_v31 = vpop.f32.mrf.mxu1 }
 0x2f3   :  { %v859_v35 = vpack.c.bf16 %v2072_v31, %v2071_v29 }
 0x2f4   :  { %v840_v33 = vpop.f32.mrf.mxu1 }
 0x2f5   :  { %v858_v34 = vpack.c.bf16 %v840_v33, %v837_v30 }
 0x2f6   :  { %v2091_v36 = vpop.f32.mrf.mxu1 }
 0x2f7   :  { %2149 = vmatprep.mubr.msk.bf16.mxu1 %vm433_vm0, %v858_v34 }
 0x2f8   :  { %v958_v37 = vpop.f32.mrf.mxu1  ;;  %2150 = vmatmul.mubr.msk.bf16.gmra.mxu1 %vm433_vm0, %v859_v35  ;;  %v2749_v35 = vld [vmem:[%s2843_s9] ss:$0 sm:$0xff] }
 0x2fa   :  { %v2092_v38 = vpop.f32.mrf.mxu1 }
 0x2fb   :  { %v1022_v25 = vpack.c.bf16 %v2092_v38, %v2091_v36 }
 0x2fc   :  { %v961_v39 = vpop.f32.mrf.mxu1 }
 0x2fd   :  { %v1021_v24 = vpack.c.bf16 %v961_v39, %v958_v37 }
 0x2fe   :  { %v2095_v40 = vpop.f32.mrf.mxu1 }
 0x2ff   :  { %2161 = vmatprep.mubr.msk.bf16.mxu0 %vm433_vm0, %v1021_v24 }
 0x300   :  { %v974_v26 = vpop.f32.mrf.mxu1  ;;  %2162 = vmatmul.mubr.msk.bf16.vlgmr.msra.gmra.mxu0 %vm433_vm0, %v1022_v25 }
 0x301   :  { %2178 = vmatpush3.bf16.msra.mxu0 %v2284_v51 }
 0x302   :  { %v2096_v41 = vpop.f32.mrf.mxu1  ;;  %2179 = vmatprep.subr.bf16.mxu0 %v2285_v54 }
 0x303   :  { %v1024_v43 = vpack.c.bf16 %v2096_v41, %v2095_v40 }
 0x304   :  { %v977_v23 = vpop.f32.mrf.mxu1 }
 0x305   :  { %v1023_v42 = vpack.c.bf16 %v977_v23, %v974_v26  ;;  %2180 = vmatpush3.bf16.msra.mxu0 %v2285_v54 }
 0x306   :  { %v2099_v44 = vpop.f32.mrf.mxu1  ;;  %2181 = vmatprep.subr.bf16.mxu0 %v2286_v55 }
 0x307   :  { %2165 = vmatprep.mubr.msk.bf16.mxu0 %vm433_vm0, %v1023_v42 }
 0x308   :  { %v990_v45 = vpop.f32.mrf.mxu1  ;;  %2166 = vmatmul.mubr.msk.bf16.gmra.mxu0 %vm433_vm0, %v1024_v43 }
 0x309   :  { %2182 = vmatpush3.bf16.msra.mxu0 %v2286_v55 }
 0x30a   :  { %v2100_v46 = vpop.f32.mrf.mxu1  ;;  %2183 = vmatprep.subr.bf16.mxu0 %v2287_v57 }
 0x30b   :  { %v1026_v19 = vpack.c.bf16 %v2100_v46, %v2099_v44 }
 0x30c   :  { %v993_v47 = vpop.f32.mrf.mxu1 }
 0x30d   :  { %v1025_v48 = vpack.c.bf16 %v993_v47, %v990_v45  ;;  %2184 = vmatpush3.bf16.msra.mxu0 %v2287_v57 }
 0x30e   :  { %v2103_v20 = vpop.f32.mrf.mxu1 }
 0x30f   :  { %2169 = vmatprep.mubr.msk.bf16.mxu0 %vm433_vm0, %v1025_v48 }
 0x310   :  { %v1006_v21 = vpop.f32.mrf.mxu1  ;;  %2170 = vmatmul.mubr.msk.bf16.gmra.mxu0 %vm433_vm0, %v1026_v19 }
 0x312   :  { %v2104_v22 = vpop.f32.mrf.mxu1 }
 0x313   :  { %v1028_v50 = vpack.c.bf16 %v2104_v22, %v2103_v20 }
 0x314   :  { %v1009_v32 = vpop.f32.mrf.mxu1 }
 0x315   :  { %v1027_v49 = vpack.c.bf16 %v1009_v32, %v1006_v21 }
 0x317   :  { %2173 = vmatprep.mubr.msk.bf16.mxu0 %vm433_vm0, %v1027_v49 }
 0x318   :  { %2174 = vmatmul.mubr.msk.bf16.gmra.mxu0 %vm433_vm0, %v1028_v50 }
 0x3a0   :  { %v2139_v63 = vpop.f32.mrf.mxu1 }
 0x3a1   :  { %v1282_v18 = vadd.f32 %v2139_v63, %v2115_v53 }
 0x3a2   :  { %v1273_v1 = vpop.f32.mrf.mxu1 }
 0x3a3   :  { %v1274_v17 = vadd.f32 %v1273_v1, %v1128_v52 }
 0x3a4   :  { %v2140_v3 = vpop.f32.mrf.mxu1 }
 0x3a5   :  { %v1285_v29 = vadd.f32 %v2140_v3, %v2116_v58 }
 0x3a6   :  { %v1276_v5 = vpop.f32.mrf.mxu1 }
 0x3a7   :  { %v1277_v34 = vadd.f32 %v1276_v5, %v1131_v59 }
 0x3a8   :  { %v2143_v7 = vpop.f32.mrf.mxu1 }
 0x3a9   :  { %v1298_v42 = vadd.f32 %v2143_v7, %v2119_v60 }
 0x3aa   :  { %v1289_v10 = vpop.f32.mrf.mxu1 }
 0x3ab   :  { %v1290_v41 = vadd.f32 %v1289_v10, %v1144_v61 }
 0x3ac   :  { %v2144_v12 = vpop.f32.mrf.mxu1 }
 0x3ad   :  { %v1301_v46 = vadd.f32 %v2144_v12, %v2120_v62 }
 0x3ae   :  { %v1292_v14 = vpop.f32.mrf.mxu1 }
 0x3af   :  { %v1293_v32 = vadd.f32 %v1292_v14, %v1147_v0 }
 0x3b0   :  { %v2147_v16 = vpop.f32.mrf.mxu1 }
 0x3b1   :  { %v1314_v62 = vadd.f32 %v2147_v16, %v2732_v2 }
 0x3b2   :  { %v1305_v27 = vpop.f32.mrf.mxu1 }
 0x3b3   :  { %v1306_v60 = vadd.f32 %v1305_v27, %v1160_v4 }
 0x3b4   :  { %v2148_v37 = vpop.f32.mrf.mxu1 }
 0x3b5   :  { %v1317_v3 = vadd.f32 %v2148_v37, %v2734_v6 }
 0x3b6   :  { %v1308_v43 = vpop.f32.mrf.mxu1 }
 0x3b8   :  { %v2151_v51 = vpop.f32.mrf.mxu1 }
 0x3ba   :  { %v1321_v63 = vpop.f32.mrf.mxu1 }
 0x3bc   :  { %v2152_v4 = vpop.f32.mrf.mxu1 }
 0x3c0   :  { %v2163_v56 = vpop.f32.mrf.mxu0 }
 0x3c1   :  { %v1492_v31 = vadd.f32 %v2163_v56, %v1282_v18 }
 0x3c2   :  { %v1427_v28 = vpop.f32.mrf.mxu0 }
 0x3c3   :  { %v1490_v30 = vadd.f32 %v1427_v28, %v1274_v17  ;;  %v1515_v40 = vadd.f32 %v2749_v35, %v1492_v31  ;;  %v1309_v17 = vadd.f32 %v1308_v43, %v2736_v8 }
 0x3c4   :  { %v2164_v33 = vpop.f32.mrf.mxu0 }
 0x3c5   :  { %v1493_v36 = vadd.f32 %v2164_v33, %v1285_v29  ;;  %v1513_v39 = vadd.f32 %v2749_v35, %v1490_v30  ;;  %v1531_v20 = vmax.f32 %v1515_v40, 0.0  ;;  %v1322_v33 = vadd.f32 %v1321_v63, %v2740_v11 }
 0x3c6   :  { %v1430_v38 = vpop.f32.mrf.mxu0 }
 0x3c7   :  { %v1516_v24 = vadd.f32 %v2749_v35, %v1493_v36  ;;  %v1491_v25 = vadd.f32 %v1430_v38, %v1277_v34  ;;  %v1529_v47 = vmax.f32 %v1513_v39, 0.0  ;;  %v1330_v34 = vadd.f32 %v2151_v51, %v2738_v9  ;;  %v1324_v36 = vpop.f32.mrf.mxu1 }
 0x3c8   :  { %v2167_v26 = vpop.f32.mrf.mxu0  ;;  %v1333_v39 = vadd.f32 %v2152_v4, %v2742_v13 }
 0x3c9   :  { %v1514_v23 = vadd.f32 %v2749_v35, %v1491_v25  ;;  %v1532_v44 = vmax.f32 %v1516_v24, 0.0  ;;  %v1496_v21 = vadd.f32 %v2167_v26, %v1298_v42  ;;  %v1325_v42 = vadd.f32 %v1324_v36, %v2744_v15 }
 0x3ca   :  { %v1443_v45 = vpop.f32.mrf.mxu0 }
 0x3cb   :  { %v1530_v48 = vmax.f32 %v1514_v23, 0.0  ;;  %v1494_v19 = vadd.f32 %v1443_v45, %v1290_v41  ;;  %v1546_v54 = vpack.c.bf16 %v1532_v44, %v1531_v20  ;;  %v1519_v58 = vadd.f32 %v2749_v35, %v1496_v21 }
 0x3cc   :  { %v2168_v22 = vpop.f32.mrf.mxu0 }
 0x3cd   :  { %v1545_v49 = vpack.c.bf16 %v1530_v48, %v1529_v47  ;;  %v1497_v50 = vadd.f32 %v2168_v22, %v1301_v46  ;;  %v1517_v57 = vadd.f32 %v2749_v35, %v1494_v19  ;;  %v1535_v12 = vmax.f32 %v1519_v58, 0.0 }
 0x3ce   :  { %v1446_v55 = vpop.f32.mrf.mxu0 }
 0x3cf   :  { %v1520_v53 = vadd.f32 %v2749_v35, %v1497_v50  ;;  %v1495_v52 = vadd.f32 %v1446_v55, %v1293_v32  ;;  %2185 = vmatprep.mubr.msk.bf16.mxu0 %vm433_vm0, %v1545_v49  ;;  %v1533_v5 = vmax.f32 %v1517_v57, 0.0  ;;  %v1848_v49 = vld [vmem:[%s2844_s11] ss:$0 sm:$0xff] }
 0x3d0   :  { %v2171_v59 = vpop.f32.mrf.mxu0  ;;  %2186 = vmatmul.mubr.msk.bf16.vlgmr.msra.gmra.mxu0 %vm433_vm0, %v1546_v54 }
 0x3d1   :  { %v1518_v61 = vadd.f32 %v2749_v35, %v1495_v52  ;;  %v1536_v0 = vmax.f32 %v1520_v53, 0.0  ;;  %v1500_v14 = vadd.f32 %v2171_v59, %v1314_v62 }
 0x3d2   :  { %v1459_v1 = vpop.f32.mrf.mxu0 }
 0x3d3   :  { %v1534_v7 = vmax.f32 %v1518_v61, 0.0  ;;  %v1498_v10 = vadd.f32 %v1459_v1, %v1306_v60  ;;  %v1548_v27 = vpack.c.bf16 %v1536_v0, %v1535_v12  ;;  %v1523_v6 = vadd.f32 %v2749_v35, %v1500_v14 }
 0x3d4   :  { %v2172_v56 = vpop.f32.mrf.mxu0 }
 0x3d5   :  { %v1547_v18 = vpack.c.bf16 %v1534_v7, %v1533_v5  ;;  %v1501_v28 = vadd.f32 %v2172_v56, %v1317_v3  ;;  %v1521_v2 = vadd.f32 %v2749_v35, %v1498_v10  ;;  %v1539_v26 = vmax.f32 %v1523_v6, 0.0 }
 0x3d6   :  { %v1462_v29 = vpop.f32.mrf.mxu0 }
 0x3d7   :  { %v1524_v16 = vadd.f32 %v2749_v35, %v1501_v28  ;;  %v1499_v30 = vadd.f32 %v1462_v29, %v1309_v17  ;;  %2189 = vmatprep.mubr.msk.bf16.mxu1 %vm433_vm0, %v1547_v18  ;;  %v1537_v24 = vmax.f32 %v1521_v2, 0.0 }
 0x3d8   :  { %v2175_v31 = vpop.f32.mrf.mxu0  ;;  %2190 = vmatmul.mubr.msk.bf16.vlgmr.msra.gmra.mxu1 %vm433_vm0, %v1548_v27 }
 0x3d9   :  { %v1522_v8 = vadd.f32 %v2749_v35, %v1499_v30  ;;  %v1540_v37 = vmax.f32 %v1524_v16, 0.0  ;;  %v1504_v41 = vadd.f32 %v2175_v31, %v1330_v34 }
 0x3da   :  { %v1475_v38 = vpop.f32.mrf.mxu0 }
 0x3db   :  { %v1538_v25 = vmax.f32 %v1522_v8, 0.0  ;;  %v1502_v40 = vadd.f32 %v1475_v38, %v1322_v33  ;;  %v1550_v11 = vpack.c.bf16 %v1540_v37, %v1539_v26  ;;  %v1527_v13 = vadd.f32 %v2749_v35, %v1504_v41 }
 0x3dc   :  { %v2176_v23 = vpop.f32.mrf.mxu0 }
 0x3dd   :  { %v1549_v43 = vpack.c.bf16 %v1538_v25, %v1537_v24  ;;  %v1505_v44 = vadd.f32 %v2176_v23, %v1333_v39  ;;  %v1525_v46 = vadd.f32 %v2749_v35, %v1502_v40  ;;  %v1543_v21 = vmax.f32 %v1527_v13, 0.0 }
 0x3de   :  { %v1478_v45 = vpop.f32.mrf.mxu0 }
 0x3df   :  { %v1528_v9 = vadd.f32 %v2749_v35, %v1505_v44  ;;  %v1503_v47 = vadd.f32 %v1478_v45, %v1325_v42  ;;  %2193 = vmatprep.mubr.msk.bf16.mxu1 %vm433_vm0, %v1549_v43  ;;  %v1541_v20 = vmax.f32 %v1525_v46, 0.0 }
 0x3e0   :  { %2194 = vmatmul.mubr.msk.bf16.gmra.mxu1 %vm433_vm0, %v1550_v11 }
 0x3e1   :  { %v1526_v48 = vadd.f32 %v2749_v35, %v1503_v47  ;;  %v1544_v19 = vmax.f32 %v1528_v9, 0.0 }
 0x3e3   :  { %v1542_v15 = vmax.f32 %v1526_v48, 0.0  ;;  %v1552_v32 = vpack.c.bf16 %v1544_v19, %v1543_v21 }
 0x3e5   :  { %v1551_v22 = vpack.c.bf16 %v1542_v15, %v1541_v20 }
 0x3e7   :  { %2197 = vmatprep.mubr.msk.bf16.mxu1 %vm433_vm0, %v1551_v22 }
 0x3e8   :  { %2198 = vmatmul.mubr.msk.bf16.gmra.mxu1 %vm433_vm0, %v1552_v32 }
 0x490   :  { %v2187_v50 = vpop.f32.mrf.mxu0 }
 0x491   :  { %v1659_v51 = vadd.f32 %v2187_v50, %v1848_v49 }
 0x492   :  { %v1650_v54 = vpop.f32.mrf.mxu0 }
 0x493   :  { %1715 = vst [vmem:[%s2845_s12 + $0x10] sm:$0xff] %v1659_v51  ;;  %v1651_v35 = vadd.f32 %v1848_v49, %v1650_v54 }
 0x494   :  { %v2188_v55 = vpop.f32.mrf.mxu0 }
 0x495   :  { %1713 = vst [vmem:[%s2845_s12] sm:$0xff] %v1651_v35  ;;  %v1662_v57 = vadd.f32 %v2188_v55, %v1848_v49 }
 0x496   :  { %v1653_v53 = vpop.f32.mrf.mxu0 }
 0x497   :  { %1716 = vst [vmem:[%s2845_s12 + $0x18] sm:$0xff] %v1662_v57  ;;  %v1654_v52 = vadd.f32 %v1848_v49, %v1653_v53 }
 0x498   :  { %v2191_v58 = vpop.f32.mrf.mxu1 }
 0x499   :  { %1714 = vst [vmem:[%s2845_s12 + $0x8] sm:$0xff] %v1654_v52  ;;  %v1675_v59 = vadd.f32 %v2191_v58, %v1848_v49 }
 0x49a   :  { %v1666_v60 = vpop.f32.mrf.mxu1 }
 0x49b   :  { %1719 = vst [vmem:[%s2845_s12 + $0x30] sm:$0xff] %v1675_v59  ;;  %v1667_v61 = vadd.f32 %v1848_v49, %v1666_v60 }
 0x49c   :  { %v2192_v62 = vpop.f32.mrf.mxu1 }
 0x49d   :  { %1717 = vst [vmem:[%s2845_s12 + $0x20] sm:$0xff] %v1667_v61  ;;  %v1678_v63 = vadd.f32 %v2192_v62, %v1848_v49 }
 0x49e   :  { %v1669_v0 = vpop.f32.mrf.mxu1 }
 0x49f   :  { %1720 = vst [vmem:[%s2845_s12 + $0x38] sm:$0xff] %v1678_v63  ;;  %v1670_v1 = vadd.f32 %v1848_v49, %v1669_v0 }
 0x4a0   :  { %v2195_v3 = vpop.f32.mrf.mxu1 }
 0x4a1   :  { %1718 = vst [vmem:[%s2845_s12 + $0x28] sm:$0xff] %v1670_v1  ;;  %v1691_v5 = vadd.f32 %v2195_v3, %v1848_v49 }
 0x4a2   :  { %v1682_v7 = vpop.f32.mrf.mxu1 }
 0x4a3   :  { %1723 = vst [vmem:[%s2845_s12 + $0x50] sm:$0xff] %v1691_v5  ;;  %v1683_v10 = vadd.f32 %v1848_v49, %v1682_v7 }
 0x4a4   :  { %v2196_v12 = vpop.f32.mrf.mxu1 }
 0x4a5   :  { %1721 = vst [vmem:[%s2845_s12 + $0x40] sm:$0xff] %v1683_v10  ;;  %v1694_v14 = vadd.f32 %v2196_v12, %v1848_v49 }
 0x4a6   :  { %v1685_v56 = vpop.f32.mrf.mxu1 }
 0x4a7   :  { %1724 = vst [vmem:[%s2845_s12 + $0x58] sm:$0xff] %v1694_v14  ;;  %v1686_v17 = vadd.f32 %v1848_v49, %v1685_v56 }
 0x4a8   :  { %v2199_v18 = vpop.f32.mrf.mxu1 }
 0x4a9   :  { %1722 = vst [vmem:[%s2845_s12 + $0x48] sm:$0xff] %v1686_v17  ;;  %v1707_v28 = vadd.f32 %v2199_v18, %v1848_v49 }
 0x4aa   :  { %v1698_v4 = vpop.f32.mrf.mxu1 }
 0x4ab   :  { %1727 = vst [vmem:[%s2845_s12 + $0x70] sm:$0xff] %v1707_v28  ;;  %v1699_v27 = vadd.f32 %v1848_v49, %v1698_v4 }
 0x4ac   :  { %v2200_v29 = vpop.f32.mrf.mxu1 }
 0x4ad   :  { %1725 = vst [vmem:[%s2845_s12 + $0x60] sm:$0xff] %v1699_v27  ;;  %v1710_v2 = vadd.f32 %v2200_v29, %v1848_v49 }
 0x4ae   :  { %v1701_v16 = vpop.f32.mrf.mxu1 }
 0x4af   :  { %1728 = vst [vmem:[%s2845_s12 + $0x78] sm:$0xff] %v1710_v2  ;;  %v1702_v30 = vadd.f32 %v1848_v49, %v1701_v16 }
 0x4b1   :  { %1726 = vst [vmem:[%s2845_s12 + $0x68] sm:$0xff] %v1702_v30 }

</bundles_post_ra>
